<compile_context>
chip_gen: v7x
topology: tpu7x:2x2x1
jax: 0.10.0
libtpu: 0.0.40
codegen_flags: <defaults>
</compile_context>

<pallas_src>
import functools
import math

import jax
import jax.numpy as jnp
from jax import lax
from jax.experimental import pallas as pl
from jax.experimental.pallas import tpu as pltpu

_LANES = 128


def _round_up(v, m):
    return ((v + m - 1) // m) * m


def _gaussian_noise_kernel(x_ref, bits_ref, o_ref, *, std):
    half = x_ref.shape[0] // 2  # static; TILE_R is a multiple of 16

    # Uniforms in [0, 1) via the mantissa bit-trick: force exponent to 127,
    # keep 23 random mantissa bits, bitcast, subtract 1.  Pure VPU bitwise ops.
    bits = bits_ref[...]
    u = lax.bitcast_convert_type(
        (bits & jnp.uint32(0x007FFFFF)) | jnp.uint32(0x3F800000), jnp.float32
    ) - jnp.float32(1.0)

    u1 = u[:half, :]
    u2 = u[half:, :]

    # Paired Box-Muller: one uniform per normal sample.
    # (1 - u1) is in (0, 1], so the log never sees 0.
    r = jnp.sqrt(jnp.float32(-2.0) * jnp.log(jnp.float32(1.0) - u1))
    theta = jnp.float32(2.0 * math.pi) * u2
    z1 = r * jnp.cos(theta)
    z2 = r * jnp.sin(theta)

    x = x_ref[...].astype(jnp.float32)
    s = jnp.float32(std)
    o_ref[:half, :] = (x[:half, :] + s * z1).astype(o_ref.dtype)
    o_ref[half:, :] = (x[half:, :] + s * z2).astype(o_ref.dtype)


def gaussian_noise(x, seed, *, std=0.05, training=True):
    """Pallas implementation of GaussianNoise.forward."""
    if not training:
        # Eval mode is the identity, exactly like the PyTorch module.
        return x

    orig_shape = x.shape
    n = x.size

    # Flatten to a lane-dense 2D slab and pad rows to a tile multiple.
    rows = -(-n // _LANES)
    tile_r = min(512, _round_up(max(rows, 16), 16))  # <=256 KiB/buffer, sublane-aligned halves
    rows_p = _round_up(rows, tile_r)
    n_p = rows_p * _LANES

    x_flat = x.reshape(-1)
    if n_p != n:
        x_flat = jnp.pad(x_flat, (0, n_p - n))
    x2 = x_flat.reshape(rows_p, _LANES)

    # One independent uint32 word per output element.
    key = jax.random.PRNGKey(seed)
    bits = jax.random.bits(key, (rows_p, _LANES), dtype=jnp.uint32)

    spec = pl.BlockSpec((tile_r, _LANES), lambda i: (i, 0))

    out2 = pl.pallas_call(
        functools.partial(_gaussian_noise_kernel, std=std),
        out_shape=jax.ShapeDtypeStruct((rows_p, _LANES), x.dtype),
        grid=(rows_p // tile_r,),
        in_specs=[spec, spec],
        out_specs=spec,
        compiler_params=pltpu.CompilerParams(
            dimension_semantics=("parallel",),  # lets v7x split tiles across its 2 TCs
        ),
        cost_estimate=pl.CostEstimate(
            flops=10 * n_p,
            transcendentals=2 * n_p,  # ~log+sqrt+cos+sin per 2 elements
            bytes_accessed=3 * n_p * 4,
        ),
    )(x2, bits)

    out_flat = out2.reshape(-1)
    if n_p != n:
        out_flat = out_flat[:n]
    return out_flat.reshape(orig_shape)


if __name__ == "__main__":
    key = jax.random.PRNGKey(0)
    # Small NCHW input consistent with the module's generic elementwise forward.
    x = jax.random.normal(key, (2, 4, 16, 16), dtype=jnp.float32)

    std = 0.05
    y_train = gaussian_noise(x, seed=0, std=std, training=True)
    y_train = jax.block_until_ready(y_train)

    y_eval = gaussian_noise(x, seed=0, std=std, training=False)
    y_eval = jax.block_until_ready(y_eval)

    # Sanity checks: shapes/dtypes preserved, eval is identity,
    # training-mode noise has roughly the requested scale.
    assert y_train.shape == x.shape and y_train.dtype == x.dtype
    assert bool(jnp.all(y_eval == x))
    noise = y_train - x
    noise_std = float(jnp.std(noise))
    noise_mean = float(jnp.mean(noise))
    assert abs(noise_mean) < 0.02, f"noise mean too large: {noise_mean}"
    assert 0.5 * std < noise_std < 1.5 * std, f"noise std off: {noise_std}"

    print("KERNEL_OK")
</pallas_src>

<mosaic_0001>
module attributes {stable_mosaic.version = 11 : i64} {
  func.func @_gaussian_noise_kernel(%arg0: i32, %arg1: memref<16x128xf32, #tpu.memory_space<vmem>>, %arg2: memref<16x128xi32, #tpu.memory_space<vmem>>, %arg3: memref<16x128xf32, #tpu.memory_space<vmem>>) attributes {dimension_semantics = [#tpu.dimension_semantics<parallel>], iteration_bounds = array<i64: 1>, scalar_prefetch = 0 : i64, scratch_operands = 0 : i64, tpu.core_type = #tpu.core_type<tc>, window_params = [{transform_indices = @transform_0, window_bounds = array<i64: 16, 128>}, {transform_indices = @transform_1, window_bounds = array<i64: 16, 128>}, {transform_indices = @transform_2, window_bounds = array<i64: 16, 128>}]} {
    %c0 = arith.constant 0 : index
    %c0_0 = arith.constant 0 : index
    %0 = vector.load %arg2[%c0, %c0_0] : memref<16x128xi32, #tpu.memory_space<vmem>>, vector<16x128xi32>
    %c8388607_i32 = arith.constant 8388607 : i32
    %1 = vector.broadcast %c8388607_i32 : i32 to vector<16x128xi32>
    %2 = arith.andi %0, %1 : vector<16x128xi32>
    %c1065353216_i32 = arith.constant 1065353216 : i32
    %3 = vector.broadcast %c1065353216_i32 : i32 to vector<16x128xi32>
    %4 = arith.ori %2, %3 : vector<16x128xi32>
    %5 = tpu.bitcast %4 : vector<16x128xi32> -> vector<16x128xf32>
    %cst = arith.constant 1.000000e+00 : f32
    %6 = vector.broadcast %cst : f32 to vector<16x128xf32>
    %7 = arith.subf %5, %6 : vector<16x128xf32>
    %8 = vector.extract_strided_slice %7 {offsets = [0, 0], sizes = [8, 128], strides = [1, 1]} : vector<16x128xf32> to vector<8x128xf32>
    %9 = vector.extract_strided_slice %7 {offsets = [8, 0], sizes = [8, 128], strides = [1, 1]} : vector<16x128xf32> to vector<8x128xf32>
    %cst_1 = arith.constant 1.000000e+00 : f32
    %10 = vector.broadcast %cst_1 : f32 to vector<8x128xf32>
    %11 = arith.subf %10, %8 : vector<8x128xf32>
    %12 = math.log %11 : vector<8x128xf32>
    %cst_2 = arith.constant -2.000000e+00 : f32
    %13 = vector.broadcast %cst_2 : f32 to vector<8x128xf32>
    %14 = arith.mulf %13, %12 : vector<8x128xf32>
    %15 = math.sqrt %14 : vector<8x128xf32>
    %cst_3 = arith.constant 6.28318548 : f32
    %16 = vector.broadcast %cst_3 : f32 to vector<8x128xf32>
    %17 = arith.mulf %16, %9 : vector<8x128xf32>
    %18 = math.cos %17 : vector<8x128xf32>
    %19 = arith.mulf %15, %18 : vector<8x128xf32>
    %20 = math.sin %17 : vector<8x128xf32>
    %21 = arith.mulf %15, %20 : vector<8x128xf32>
    %c0_4 = arith.constant 0 : index
    %c0_5 = arith.constant 0 : index
    %22 = vector.load %arg1[%c0_4, %c0_5] : memref<16x128xf32, #tpu.memory_space<vmem>>, vector<16x128xf32>
    %23 = vector.extract_strided_slice %22 {offsets = [0, 0], sizes = [8, 128], strides = [1, 1]} : vector<16x128xf32> to vector<8x128xf32>
    %cst_6 = arith.constant 5.000000e-02 : f32
    %24 = vector.broadcast %cst_6 : f32 to vector<8x128xf32>
    %25 = arith.mulf %24, %19 : vector<8x128xf32>
    %26 = arith.addf %23, %25 : vector<8x128xf32>
    %c0_7 = arith.constant 0 : index
    %c0_8 = arith.constant 0 : index
    %27 = vector.load %arg3[%c0_7, %c0_8] : memref<16x128xf32, #tpu.memory_space<vmem>>, vector<8x128xf32>
    tpu.vector_store %arg3[%c0_7, %c0_8], %26 {strides = array<i32>} : memref<16x128xf32, #tpu.memory_space<vmem>>, vector<8x128xf32>,
    %28 = vector.extract_strided_slice %22 {offsets = [8, 0], sizes = [8, 128], strides = [1, 1]} : vector<16x128xf32> to vector<8x128xf32>
    %cst_9 = arith.constant 5.000000e-02 : f32
    %29 = vector.broadcast %cst_9 : f32 to vector<8x128xf32>
    %30 = arith.mulf %29, %21 : vector<8x128xf32>
    %31 = arith.addf %28, %30 : vector<8x128xf32>
    %c8 = arith.constant 8 : index
    %c0_10 = arith.constant 0 : index
    %32 = vector.load %arg3[%c8, %c0_10] : memref<16x128xf32, #tpu.memory_space<vmem>>, vector<8x128xf32>
    tpu.vector_store %arg3[%c8, %c0_10], %31 {strides = array<i32>} : memref<16x128xf32, #tpu.memory_space<vmem>>, vector<8x128xf32>,
    return
  }
  func.func @transform_0(%arg0: i32) -> (i32, i32) {
    %c0_i32 = arith.constant 0 : i32
    %c0_i32_0 = arith.constant 0 : i32
    return %arg0, %c0_i32 : i32, i32
  }
  func.func @transform_1(%arg0: i32) -> (i32, i32) {
    %c0_i32 = arith.constant 0 : i32
    %c0_i32_0 = arith.constant 0 : i32
    return %arg0, %c0_i32 : i32, i32
  }
  func.func @transform_2(%arg0: i32) -> (i32, i32) {
    %c0_i32 = arith.constant 0 : i32
    %c0_i32_0 = arith.constant 0 : i32
    return %arg0, %c0_i32 : i32, i32
  }
}

</mosaic_0001>

<bundles_post_ra>
// kernel: tpu_custom_call.1
= control target key start
LH: loop header
LB: loop body
LE: loop exit
PB: predicated region body
PF: predicated region fallthrough
CT: control target
= control target key end

     0   :  { %7 = vsyncpa [#allocation3], 0  ;;  %s497_s0 = inlined_call_operand.hbm [shape: f32[16,128], index: 0, kind: input, shape index: {}]   ;;  %s498_s1 = inlined_call_operand.hbm [shape: u32[16,128], index: 1, kind: input, shape index: {}]   ;;  %s499_s2 = inlined_call_operand.hbm [shape: f32[16,128], index: 2, kind: output, shape index: {}]  }
   0x1   :  { %8 = vsyncpa [#allocation6], 0 }
   0x2   :  { %9 = vsyncpa [#allocation4], 0  ;;  %s402_s9 = smov [#allocation2]   ;;  %s330_s13 = scalar_lea.hbm %s497_s0, 256 }
   0x3   :  { %s15_s10 = sshll.u32 %s402_s9, 4  ;;  %p331_p0 = scmp.ne.s32.totalorder %s497_s0, %s330_s13  ;;  %s16_s10 = int_to_ptr.vmem [resolvable:$true] %s15_s10 }
   0x4   :  { %p334_p1 = scmp.lt.u32.totalorder %s330_s13, %s497_s0 }
   0x6   :  { %p336_p2 = pnand %p334_p1, %p331_p0 }
   0x8   :  { %339 = shalt.err (!%p336_p2)
}
   0x9   :  { %s340_s18 = scalar_lea.vmem %s16_s10, 256  ;;  %p345_p4 = scmp.lt.s32.totalorder %s16_s10, %s16_s10 }
   0xa   :  { %p341_p3 = scmp.ne.s32.totalorder %s16_s10, %s340_s18  ;;  %p346_p5 = scmp.lt.s32.totalorder %s340_s18, %s340_s18 }
   0xc   :  { %p347_p6 = por %p346_p5, %p345_p4 }
   0xe   :  { %p348_p7 = pnand %p347_p6, %p341_p3 }
  0x10   :  { %351 = shalt.err (!%p348_p7)
}
  0x11   :  { %s403_s19 = smov 128   ;;  %s404_s20 = smov 8  }
  0x12   :  { %21 = dma.hbm_to_vmem [thread:$0]  %s497_s0, 256, %s16_s10, [#allocation3], %s403_s19, %s403_s19, %s404_s20  }
  0x13   :  { %s405_s23 = smov [#allocation5]   ;;  %s352_s27 = scalar_lea.hbm %s498_s1, 256 }
  0x14   :  { %s27_s24 = sshll.u32 %s405_s23, 4  ;;  %p353_p8 = scmp.ne.s32.totalorder %s498_s1, %s352_s27  ;;  %s28_s24 = int_to_ptr.vmem [resolvable:$true] %s27_s24 }
  0x15   :  { %p356_p9 = scmp.lt.u32.totalorder %s352_s27, %s498_s1 }
  0x17   :  { %p358_p10 = pnand %p356_p9, %p353_p8 }
  0x19   :  { %361 = shalt.err (!%p358_p10)
}
  0x1a   :  { %s362_s4 = scalar_lea.vmem %s28_s24, 256  ;;  %p367_p12 = scmp.lt.s32.totalorder %s28_s24, %s28_s24 }
  0x1b   :  { %p363_p11 = scmp.ne.s32.totalorder %s28_s24, %s362_s4  ;;  %p368_p13 = scmp.lt.s32.totalorder %s362_s4, %s362_s4 }
  0x1d   :  { %p369_p0 = por %p368_p13, %p367_p12 }
  0x1f   :  { %p370_p1 = pnand %p369_p0, %p363_p11 }
  0x21   :  { %373 = shalt.err (!%p370_p1)
}
  0x22   :  { %33 = dma.hbm_to_vmem [thread:$0]  %s498_s1, 256, %s28_s24, [#allocation6], %s403_s19, %s403_s19, %s404_s20  }
  0x23   :  { %396 = dma.done.wait [#allocation3], 256  }
  0x24   :  { %397 = vsyncadd [#allocation3], 4294967040 }
  0x25   :  { %398 = dma.done.wait [#allocation6], 256  }
  0x26   :  { %399 = vsyncadd [#allocation6], 4294967040  ;;  %v41_v0 = vld [vmem:[#allocation5 + $0x8] sm:$0xff]  ;;  %v406_v15 = vmov 683565275   ;;  %v40_v38 = vld [vmem:[#allocation5] sm:$0xff] }
  0x27   :  { %v43_v1 = vand.u32 8388607, %v41_v0  ;;  %v407_v17 = vmov 2475754826   ;;  %v408_v19 = vmov 2131351028  }
  0x28   :  { %v409_v23 = vmov 2102212464   ;;  %v410_v28 = vmov 920167782   ;;  %v411_v34 = vmov 1326507024  }
  0x29   :  { %v45_v2 = vor.u32 1065353216, %v43_v1  ;;  %v42_v48 = vand.u32 8388607, %v40_v38  ;;  %s412_s1 = smov [#allocation7]  }
  0x2a   :  { %s284_s6 = sshll.u32 %s412_s1, 4  ;;  %s285_s6 = int_to_ptr.vmem [resolvable:$true] %s284_s6 }
  0x2b   :  { %v298_v3 = vadd.f32 -1.0, %v45_v2  ;;  %v44_v58 = vor.u32 1065353216, %v42_v48  ;;  %s374_s7 = scalar_lea.vmem %s285_s6, 256  ;;  %p379_p3 = scmp.lt.s32.totalorder %s285_s6, %s285_s6 }
  0x2c   :  { %p375_p2 = scmp.ne.s32.totalorder %s285_s6, %s374_s7  ;;  %p380_p4 = scmp.lt.s32.totalorder %s374_s7, %s374_s7 }
  0x2d   :  { %v458_v4 = vmul.f32 6.2831855, %v298_v3  ;;  %v297_v62 = vadd.f32 -1.0, %v44_v58 }
  0x2e   :  { %p381_p5 = por %p380_p4, %p379_p3 }
  0x2f   :  { %v65_v5 = vand.u32 2139095040, %v458_v4  ;;  %v62_v9 = vand.u32 2147483647, %v458_v4  ;;  %v50_v1 = vsub.f32 1.0, %v297_v62  ;;  %vm64_vm7 = vcmp.lt.s32.totalorder %v458_v4, 0 }
  0x30   :  { %p382_p6 = pnand %p381_p5, %p375_p2 }
  0x31   :  { %v66_v6 = vshrl.u32 %v65_v5, 23  ;;  %v69_v12 = vand.u32 8388607, %v62_v9  ;;  %322 = vlog2.f32 %v50_v1  ;;  %vm63_vm8 = vcmp.le.f32.partialorder %v62_v9, 0.7853982 }
  0x33   :  { %v299_v7 = vadd.s32 4294967169, %v66_v6  ;;  %v70_v26 = vor.u32 8388608, %v69_v12 }
  0x35   :  { %v72_v8 = vadd.s32 1, %v299_v7  ;;  %v110_v41 = vshll.u32 %v70_v26, 8 }
  0x37   :  { %vm73_vm0 = vcmp.gt.s32.totalorder %v72_v8, 0 }
  0x38   :  { %v74_v10 = vsel %vm73_vm0, %v72_v8, 0 }
  0x39   :  { %v76_v11 = vand.u32 31, %v74_v10  ;;  %v75_v13 = vshrl.u32 %v74_v10, 5 }
  0x3b   :  { %v77_v14 = vsub.s32 32, %v76_v11  ;;  %v79_v16 = vshll.u32 %v406_v15, %v76_v11  ;;  %v82_v18 = vshll.u32 %v407_v17, %v76_v11  ;;  %v85_v20 = vshll.u32 %v408_v19, %v76_v11 }
  0x3c   :  { %v88_v25 = vshll.u32 %v409_v23, %v76_v11  ;;  %v91_v29 = vshll.u32 %v410_v28, %v76_v11  ;;  %vm94_vm1 = vcmp.lt.s32.totalorder %v75_v13, 1  ;;  %vm97_vm2 = vcmp.lt.s32.totalorder %v75_v13, 4  ;;  %v323_v11 = vpop.eup %322 }
  0x3d   :  { %v80_v21 = vshrl.u32 %v407_v17, %v77_v14  ;;  %v83_v22 = vshrl.u32 %v408_v19, %v77_v14  ;;  %v86_v24 = vshrl.u32 %v409_v23, %v77_v14  ;;  %v78_v27 = vshrl.u32 %v406_v15, %v77_v14 }
  0x3e   :  { %v89_v33 = vshrl.u32 %v410_v28, %v77_v14  ;;  %v92_v35 = vshrl.u32 %v411_v34, %v77_v14  ;;  %vm96_vm3 = vcmp.lt.s32.totalorder %v75_v13, 3  ;;  %vm95_vm4 = vcmp.lt.s32.totalorder %v75_v13, 2 }
  0x3f   :  { %v81_v30 = vor.u32 %v80_v21, %v79_v16  ;;  %v84_v31 = vor.u32 %v83_v22, %v82_v18  ;;  %v87_v32 = vor.u32 %v86_v24, %v85_v20  ;;  %v52_v16 = vmul.f32 0.6931472, %v323_v11 }
  0x40   :  { %v90_v36 = vor.u32 %v89_v33, %v88_v25  ;;  %v93_v39 = vor.u32 %v92_v35, %v91_v29 }
  0x41   :  { %v99_v37 = vsel %vm97_vm2, %v87_v32, 2102212464  ;;  %v102_v40 = vsel %vm94_vm1, %v81_v30, %v84_v31  ;;  %v98_v42 = vsel %vm94_vm1, %v78_v27, %v81_v30  ;;  %v106_v45 = vsel %vm94_vm1, %v84_v31, %v87_v32 }
  0x42   :  { %v100_v43 = vsel %vm96_vm3, %v84_v31, %v99_v37  ;;  %v103_v44 = vsel %vm97_vm2, %v90_v36, 920167782  ;;  %v107_v47 = vsel %vm97_vm2, %v93_v39, 1326507024  ;;  %v53_v21 = vmul.f32 -2.0, %v52_v16 }
  0x43   :  { %v104_v46 = vsel %vm96_vm3, %v87_v32, %v103_v44  ;;  %v108_v50 = vsel %vm96_vm3, %v90_v36, %v107_v47  ;;  %v101_v51 = vsel %vm95_vm4, %v98_v42, %v100_v43  ;;  %vm154_vm1 = vweird.f32 %v458_v4 }
  0x44   :  { %v105_v49 = vsel %vm95_vm4, %v102_v40, %v104_v46  ;;  %v109_v52 = vsel %vm95_vm4, %v106_v45, %v108_v50  ;;  %v117_v57 = vmul.u32 %v110_v41, %v101_v51  ;;  %324 = vrsqrt.f32 %v53_v21 }
  0x45   :  { %v467_v53 = vmul.u32.u64.low %v110_v41, %v105_v49  ;;  %v468_v54 = vmul.u32.u64.high %v110_v41, %v105_v49, %v467_v53  ;;  %v470_v55 = vmul.u32.u64.low %v110_v41, %v109_v52  ;;  %v471_v56 = vmul.u32.u64.high %v110_v41, %v109_v52, %v470_v55 }
  0x46   :  { %vm56_vm9 = vcmp.eq.f32.partialorder %v53_v21, inf  ;;  %vm58_vm10 = vcmp.eq.f32.partialorder %v53_v21, 0.0  ;;  %v59_v38 = vand.u32 2147483648, %v53_v21 }
  0x47   :  { %v120_v59 = vadd.s32 1, %v468_v54  ;;  %vm119_vm5 = vc.u32 %v471_v56, %v467_v53  ;;  %v118_v10 = vadd.s32 %v467_v53, %v471_v56  ;;  %v271_v53 = vld [vmem:[#allocation2] sm:$0xff] }
  0x49   :  { %v121_v60 = vsel %vm119_vm5, %v120_v59, %v468_v54  ;;  %v272_v54 = vld [vmem:[#allocation2 + $0x8] sm:$0xff] }
  0x4a   :  { %v122_v61 = vadd.s32 %v121_v60, %v117_v57 }
  0x4c   :  { %v123_v63 = vadd.s32 536870912, %v122_v61 }
  0x4e   :  { %v124_v0 = vshrl.u32 %v123_v63, 30  ;;  %v325_v33 = vpop.eup %324 }
  0x4f   :  { %v55_v36 = vmul.f32 %v325_v33, %v53_v21 }
  0x50   :  { %v125_v2 = vshll.u32 %v124_v0, 30  ;;  %v148_v25 = vsub.s32 4, %v124_v0 }
  0x51   :  { %v57_v39 = vsel %vm56_vm9, %v53_v21, %v55_v36 }
  0x52   :  { %v126_v3 = vsub.s32 %v122_v61, %v125_v2  ;;  %v149_v28 = vsel %vm64_vm7, %v148_v25, %v124_v0  ;;  %v60_v44 = vsel %vm58_vm10, %v59_v38, %v57_v39 }
  0x53   :  { %v151_v31 = vsel %vm63_vm8, 0, %v149_v28 }
  0x54   :  { %v128_v5 = vsub.s32 0, %v126_v3  ;;  %v259_v32 = vadd.s32 3, %v151_v31  ;;  %v155_v34 = vand.u32 3, %v151_v31 }
  0x56   :  { %v300_v6 = vmin.u32 %v128_v5, %v126_v3  ;;  %v260_v35 = vand.u32 3, %v259_v32  ;;  %vm160_vm11 = vcmp.eq.s32.totalorder %v155_v34, 2  ;;  %vm157_vm13 = vcmp.eq.s32.totalorder %v155_v34, 0 }
  0x57   :  { %vm156_vm15 = vcmp.lt.s32.totalorder %v155_v34, 2 }
  0x58   :  { %v130_v7 = vclz %v300_v6  ;;  %vm265_vm12 = vcmp.eq.s32.totalorder %v260_v35, 2  ;;  %vm262_vm14 = vcmp.eq.s32.totalorder %v260_v35, 0  ;;  %vm261_vm0 = vcmp.lt.s32.totalorder %v260_v35, 2 }
  0x5a   :  { %v301_v8 = vadd.s32 4294967294, %v130_v7 }
  0x5c   :  { %vm302_vm6 = vcmp.lt.s32.totalorder %v301_v8, 0 }
  0x5d   :  { %v133_v12 = vsel %vm302_vm6, 0, %v301_v8 }
  0x5e   :  { %v134_v13 = vsub.s32 32, %v133_v12  ;;  %v135_v14 = vshll.u32 %v126_v3, %v133_v12  ;;  %v138_v15 = vsub.s32 4294967266, %v133_v12 }
  0x60   :  { %v136_v17 = vshrl.u32 %v118_v10, %v134_v13  ;;  %v139_v18 = vadd.s32 127, %v138_v15 }
  0x62   :  { %v137_v19 = vor.u32 %v136_v17, %v135_v14  ;;  %v140_v20 = vshll.u32 %v139_v18, 23 }
  0x64   :  { %v141_v22 = vor.u32 4788187, %v140_v20  ;;  %v144_v23 = vcvt.s32.f32 %v137_v19 }
  0x66   :  { %v142_v24 = vand.u32 2147483647, %v141_v22 }
  0x68   :  { %v145_v26 = vmul.f32 %v144_v23, %v142_v24 }
  0x6a   :  { %v146_v27 = vxor.u32 2147483648, %v145_v26 }
  0x6c   :  { %v147_v29 = vsel %vm64_vm7, %v146_v27, %v145_v26 }
  0x6d   :  { %v150_v30 = vsel %vm63_vm8, %v458_v4, %v147_v29 }
  0x6e   :  { %326 = vcosq.f32 %v150_v30 }
  0x6f   :  { %328 = vsinq.f32 %v150_v30 }
  0x78   :  { %v327_v37 = vpop.eup %326 }
  0x79   :  { %v329_v9 = vpop.eup %328  ;;  %v161_v40 = vxor.u32 2147483648, %v327_v37 }
  0x7a   :  { %v158_v41 = vxor.u32 2147483648, %v329_v9 }
  0x7b   :  { %v162_v42 = vsel %vm160_vm11, %v161_v40, %v329_v9  ;;  %v267_v43 = vsel %vm265_vm12, %v161_v40, %v329_v9 }
  0x7c   :  { %v159_v45 = vsel %vm157_vm13, %v327_v37, %v158_v41  ;;  %v264_v46 = vsel %vm262_vm14, %v327_v37, %v158_v41 }
  0x7d   :  { %v163_v47 = vsel %vm156_vm15, %v159_v45, %v162_v42  ;;  %v268_v48 = vsel %vm261_vm0, %v264_v46, %v267_v43 }
  0x7e   :  { %v164_v49 = vsel %vm154_vm1, nan, %v163_v47  ;;  %v269_v50 = vsel %vm154_vm1, nan, %v268_v48 }
  0x7f   :  { %v165_v51 = vmul.f32 %v164_v49, %v60_v44  ;;  %v270_v52 = vmul.f32 %v269_v50, %v60_v44 }
  0x81   :  { %v273_v55 = vmul.f32 0.05, %v165_v51  ;;  %v276_v56 = vmul.f32 0.05, %v270_v52 }
  0x83   :  { %v274_v57 = vadd.f32 %v273_v55, %v271_v53  ;;  %v277_v58 = vadd.f32 %v276_v56, %v272_v54 }
  0x85   :  { %275 = vst [vmem:[#allocation7] sm:$0xff] %v274_v57  ;;  %278 = vst [vmem:[#allocation7 + $0x8] sm:$0xff] %v277_v58 }
  0x86   :  { %385 = shalt.err (!%p382_p6)
}
  0x87   :  { %s386_s10 = scalar_lea.hbm %s499_s2, 256 }
  0x88   :  { %p387_p7 = scmp.ne.s32.totalorder %s499_s2, %s386_s10  ;;  %p390_p8 = scmp.lt.u32.totalorder %s386_s10, %s499_s2 }
  0x8a   :  { %p392_p9 = pnand %p390_p8, %p387_p7 }
  0x8c   :  { %395 = shalt.err (!%p392_p9)
}
  0x8d   :  { %290 = dma.vmem_to_hbm [thread:$0]  %s285_s6, 256, %s499_s2, [#allocation4], %s403_s19, %s403_s19, %s404_s20  }
  0x8e   :  { %400 = dma.done.wait [#allocation4], 256  }
  0x8f   :  { %401 = vsyncadd [#allocation4], 4294967040 }
  0x90   :  { %294 = vsyncpa [#allocation3], 1 }
  0x91   :  { %295 = vsyncpa [#allocation6], 1 }
  0x92   :  { %296 = vsyncpa [#allocation4], 1 }

</bundles_post_ra>
